<compile_context>
chip_gen: v5e
topology: v5e:2x2
jax: 0.10.0
libtpu: 0.0.40
codegen_flags: <defaults>
</compile_context>

<pallas_src>
import functools

import jax
import jax.numpy as jnp
from jax.experimental import pallas as pl
from jax.experimental.pallas import tpu as pltpu


# ---------------------------------------------------------------------------
# Kernels
# ---------------------------------------------------------------------------

def _b1_panel(b1_ref, k, k_tile):
    """Slice the resident (1, d_ff) bias to the current d_ff panel."""
    if b1_ref.shape[1] == k_tile:            # single panel: use the whole bias
        return b1_ref[...]
    start = pl.multiple_of(k * k_tile, k_tile)
    return b1_ref[:, pl.ds(start, k_tile)]


def _ffn_kernel_f32out(x_ref, w1_ref, b1_ref, w2_ref, b2_ref, o_ref):
    """relu(x @ W1[:,panel] + b1[panel]) @ W2[panel,:], accumulated into o_ref.

    Used when the output dtype is float32: o_ref doubles as the f32 accumulator
    (zeroed at k==0, bias b2 added at the last k), so no scratch is needed.
    """
    k = pl.program_id(1)
    k_tile = w1_ref.shape[1]

    @pl.when(k == 0)
    def _init():
        o_ref[...] = jnp.zeros_like(o_ref)

    b1 = _b1_panel(b1_ref, k, k_tile)
    h = jnp.dot(x_ref[...], w1_ref[...], preferred_element_type=jnp.float32)
    h = jnp.maximum(h + b1, 0.0)                             # bias + ReLU in f32
    # TODO(synk): dropout is eval-mode identity; training mode needs
    # pltpu.prng_seed / pltpu.prng_random_bits masking + 1/(1-p) scaling.
    o_ref[...] += jnp.dot(h.astype(w2_ref.dtype), w2_ref[...],
                          preferred_element_type=jnp.float32)

    @pl.when(k == pl.num_programs(1) - 1)
    def _finalize():
        o_ref[...] += b2_ref[...]


def _ffn_kernel_acc(x_ref, w1_ref, b1_ref, w2_ref, b2_ref, o_ref, acc_ref):
    """Same computation but with an f32 scratch accumulator (non-f32 outputs)."""
    k = pl.program_id(1)
    k_tile = w1_ref.shape[1]

    @pl.when(k == 0)
    def _init():
        acc_ref[...] = jnp.zeros_like(acc_ref)

    b1 = _b1_panel(b1_ref, k, k_tile)
    h = jnp.dot(x_ref[...], w1_ref[...], preferred_element_type=jnp.float32)
    h = jnp.maximum(h + b1, 0.0)
    acc_ref[...] += jnp.dot(h.astype(w2_ref.dtype), w2_ref[...],
                            preferred_element_type=jnp.float32)

    @pl.when(k == pl.num_programs(1) - 1)
    def _finalize():
        o_ref[...] = (acc_ref[...] + b2_ref[...]).astype(o_ref.dtype)


# ---------------------------------------------------------------------------
# Tile selection (generation-aware, VMEM-budget driven)
# ---------------------------------------------------------------------------

def _round_up(x, m):
    return -(-x // m) * m


def _vmem_capacity_bytes():
    try:
        return int(pltpu.get_tpu_info().vmem_capacity_bytes)
    except Exception:
        return 64 * 2**20          # conservative: v7x has 64 MiB per TensorCore


def _footprint_bytes(row_tile, k_tile, d_model, d_ff,
                     esz_x, esz_w, esz_o, use_acc):
    """Approximate VMEM footprint of one pipelined grid step."""
    x_t = row_tile * d_model * esz_x               # x tile
    w1_p = d_model * k_tile * esz_w                # W1 panel
    w2_p = k_tile * d_model * esz_w                # W2 panel
    out_t = row_tile * d_model * esz_o             # output tile
    acc = row_tile * d_model * 4 if use_acc else 0
    h_tmp = row_tile * k_tile * (4 + (esz_w if esz_w < 4 else 0))  # f32 h + cast copy
    bias = 2 * (d_ff + d_model) * 4                # resident b1 / b2 (f32), 2 bufs
    return 2 * (x_t + w1_p + w2_p + out_t) + acc + h_tmp + bias


def _choose_tiles(n_rows, d_model, d_ff, esz_x, esz_w, esz_o, use_acc, budget,
                  row_tile=None, k_tile=None):
    def fits(rt, kt):
        return _footprint_bytes(rt, kt, d_model, d_ff,
                                esz_x, esz_w, esz_o, use_acc) <= budget

    # d_ff panels: prefer fully-resident weights (k grid extent 1) when they fit
    # the budget, else the largest 128-multiple divisor of d_ff (avoid k_tile=128
    # when possible: small panels multiply the f32 accumulator RMW traffic and
    # per-step grid overhead, notably on v5e's single vst slot).
    if k_tile is not None:
        assert d_ff % k_tile == 0, "k_tile must divide d_ff"
        k_opts = [k_tile]
    else:
        k_opts = list(dict.fromkeys(
            t for t in (d_ff, 1024, 512, 256, 128)
            if t <= d_ff and d_ff % t == 0 and (t == d_ff or t % 128 == 0)))
        if not k_opts:
            # TODO(synk): d_ff not a multiple of 128 -> one full panel; a very
            # large odd d_ff would be better served by padding the hidden dim.
            k_opts = [d_ff]

    row_align = 16 if esz_x < 4 else 8             # bf16 packs 16 rows per vreg
    if row_tile is not None:
        row_opts = [row_tile]
    elif n_rows <= 256:
        row_opts = [max(row_align, _round_up(n_rows, row_align))]
    else:
        row_opts = [t for t in (1024, 512, 384, 256, 128) if t <= n_rows]
        if not row_opts:
            row_opts = [_round_up(n_rows, row_align)]

    chosen = None
    for rt in row_opts:                            # largest row tile first
        for kt in k_opts:                          # largest d_ff panel first
            if fits(rt, kt):
                chosen = (rt, kt)
                break
        if chosen is not None:
            break
    if chosen is None:                             # even the smallest combo busts
        chosen = (row_opts[-1], k_opts[-1])        # the budget; vmem_limit is sized
    rt, kt = chosen                                # from the real footprint below

    # Skip the jnp.pad copy of x when a nearly-as-large row tile divides the
    # token count exactly.
    if row_tile is None and n_rows % rt != 0:
        for alt in row_opts:
            if alt < rt and 2 * alt >= rt and n_rows % alt == 0 and fits(alt, kt):
                rt = alt
                break
    return rt, kt


# ---------------------------------------------------------------------------
# Public wrapper
# ---------------------------------------------------------------------------

def cast_weights(w1, w2, compute_dtype=jnp.bfloat16):
    """Cast W1/W2 once, outside jit, so the per-call weight astype disappears."""
    return w1.astype(compute_dtype), w2.astype(compute_dtype)


@functools.partial(jax.jit,
                   static_argnames=("row_tile", "k_tile", "compute_dtype"))
def feedforward(x, w1, b1, w2, b2, *, row_tile=None, k_tile=None,
                compute_dtype=jnp.bfloat16):
    """relu(x @ W1 + b1) @ W2 + b2 with eval-mode dropout (identity).

    x: (..., d_model).  Weights stored as (in_features, out_features).
    compute_dtype: matmul operand dtype (default bf16 for MXU peak on
    v5e/v6e/v7x); accumulation is always f32 and the output keeps x's dtype.
    Pass compute_dtype=None to use dtypes as given.  Pre-cast W1/W2 with
    cast_weights() to avoid a per-call weight cast in HBM.
    """
    orig_shape = x.shape
    out_dtype = x.dtype
    d_model = orig_shape[-1]
    d_ff = w1.shape[1]

    if compute_dtype is not None:
        x = x.astype(compute_dtype)       # no-ops when already the right dtype
        w1 = w1.astype(compute_dtype)
        w2 = w2.astype(compute_dtype)

    x2d = x.reshape(-1, d_model)
    n_rows = x2d.shape[0]

    esz_x = x2d.dtype.itemsize
    esz_w = w1.dtype.itemsize
    esz_o = jnp.dtype(out_dtype).itemsize
    use_acc = jnp.dtype(out_dtype) != jnp.dtype(jnp.float32)

    vmem_cap = _vmem_capacity_bytes()              # 64 MiB v7x, 128 MiB v5e/v6e
    budget = int(vmem_cap * 3 // 4)
    row_tile, k_tile = _choose_tiles(n_rows, d_model, d_ff, esz_x, esz_w, esz_o,
                                     use_acc, budget, row_tile, k_tile)

    # Pad tokens only if the chosen row tile does not divide them.
    n_pad = (-n_rows) % row_tile
    if n_pad:
        x2d = jnp.pad(x2d, ((0, n_pad), (0, 0)))
    n_rows_p = n_rows + n_pad

    b1_2d = b1.reshape(1, d_ff)
    b2_2d = b2.reshape(1, d_model)

    grid = (n_rows_p // row_tile, d_ff // k_tile)  # rows parallel, d_ff reduction last
    n_row_tiles = grid[0]

    footprint = _footprint_bytes(row_tile, k_tile, d_model, d_ff,
                                 esz_x, esz_w, esz_o, use_acc)
    vmem_limit = int(min(vmem_cap - (2 << 20),
                         max(footprint + (4 << 20), 32 << 20)))

    flops = 4 * n_rows_p * d_model * d_ff          # two matmuls, 2 flops/MAC
    bytes_accessed = int(
        n_rows_p * d_model * (esz_x + esz_o)                   # x in + out
        + n_row_tiles * (w1.size + w2.size) * esz_w            # weights re-streamed
        + b1.size * b1.dtype.itemsize + b2.size * b2.dtype.itemsize)

    if use_acc:
        kernel = _ffn_kernel_acc
        scratch = [pltpu.VMEM((row_tile, d_model), jnp.float32)]
    else:
        kernel = _ffn_kernel_f32out                # accumulate straight into o_ref
        scratch = []

    out2d = pl.pallas_call(
        kernel,
        out_shape=jax.ShapeDtypeStruct((n_rows_p, d_model), out_dtype),
        grid_spec=pltpu.PrefetchScalarGridSpec(
            num_scalar_prefetch=0,
            grid=grid,
            in_specs=[
                pl.BlockSpec((row_tile, d_model), lambda i, k: (i, 0)),  # x tile
                pl.BlockSpec((d_model, k_tile), lambda i, k: (0, k)),    # W1 panel
                pl.BlockSpec((1, d_ff), lambda i, k: (0, 0)),            # b1 resident
                pl.BlockSpec((k_tile, d_model), lambda i, k: (k, 0)),    # W2 panel
                pl.BlockSpec((1, d_model), lambda i, k: (0, 0)),         # b2 resident
            ],
            out_specs=pl.BlockSpec((row_tile, d_model), lambda i, k: (i, 0)),
            scratch_shapes=scratch,
        ),
        compiler_params=pltpu.CompilerParams(
            dimension_semantics=("parallel", "arbitrary"),
            vmem_limit_bytes=vmem_limit),
        cost_estimate=pl.CostEstimate(flops=flops, transcendentals=0,
                                      bytes_accessed=bytes_accessed),
    )(x2d, w1, b1_2d, w2, b2_2d)

    out2d = out2d[:n_rows]
    return out2d.reshape(orig_shape)


def init_feedforward_params(key, d_model, d_ff, dtype=jnp.float32):
    """Deterministic init mimicking torch.nn.Linear (uniform +-1/sqrt(fan_in)).

    Weights are stored as (in_features, out_features), i.e. the transpose of
    PyTorch's (out, in) layout, so the kernel computes x @ W directly.
    """
    k1, k2, k3, k4 = jax.random.split(key, 4)
    bound1 = 1.0 / (d_model ** 0.5)
    bound2 = 1.0 / (d_ff ** 0.5)
    w1 = jax.random.uniform(k1, (d_model, d_ff), dtype, -bound1, bound1)
    b1 = jax.random.uniform(k2, (d_ff,), dtype, -bound1, bound1)
    w2 = jax.random.uniform(k3, (d_ff, d_model), dtype, -bound2, bound2)
    b2 = jax.random.uniform(k4, (d_model,), dtype, -bound2, bound2)
    return w1, b1, w2, b2


if __name__ == "__main__":
    # Small but MXU/lane friendly shapes (d_model multiple of 128 so the output
    # slab is lane-dense; d_ff=256 gives two 128-wide d_ff panels when forced).
    batch, seq, d_model, d_ff = 2, 8, 128, 256

    key = jax.random.PRNGKey(0)
    kx, kp = jax.random.split(key)
    x = jax.random.normal(kx, (batch, seq, d_model), jnp.float32)
    w1, b1, w2, b2 = init_feedforward_params(kp, d_model, d_ff)

    ref = jnp.maximum(x @ w1 + b1, 0.0) @ w2 + b2

    # 1) f32 compute path with explicit small tiles: exercises the 2-D grid
    #    (2 row tiles x 2 d_ff panels) and the accumulate-into-o_ref kernel.
    out = jax.block_until_ready(
        feedforward(x, w1, b1, w2, b2, row_tile=8, k_tile=128, compute_dtype=None))
    assert out.shape == x.shape and out.dtype == x.dtype
    assert jnp.allclose(out, ref, atol=1e-5, rtol=1e-5)

    # 2) Default path: bf16 compute (weights pre-cast once, outside jit),
    #    auto-tiled against the VMEM budget (weights fully resident here).
    w1_bf, w2_bf = cast_weights(w1, w2, jnp.bfloat16)
    out_bf = jax.block_until_ready(feedforward(x, w1_bf, b1, w2_bf, b2))
    assert out_bf.shape == x.shape and out_bf.dtype == x.dtype
    assert jnp.allclose(out_bf, ref, atol=5e-2, rtol=5e-2)

    # 3) Non-multiple token count (3*5=15 rows): exercises the row-padding path.
    x_odd = jax.random.normal(kx, (3, 5, d_model), jnp.float32)
    ref_odd = jnp.maximum(x_odd @ w1 + b1, 0.0) @ w2 + b2
    out_odd = jax.block_until_ready(feedforward(x_odd, w1_bf, b1, w2_bf, b2))
    assert out_odd.shape == x_odd.shape
    assert jnp.allclose(out_odd, ref_odd, atol=5e-2, rtol=5e-2)

    # 4) bf16 activations in / bf16 out: exercises the scratch-accumulator kernel.
    x_bf = x.astype(jnp.bfloat16)
    out_bf16 = jax.block_until_ready(feedforward(x_bf, w1_bf, b1, w2_bf, b2))
    assert out_bf16.dtype == jnp.bfloat16
    assert jnp.allclose(out_bf16.astype(jnp.float32), ref, atol=5e-2, rtol=5e-2)

    print("KERNEL_OK")
</pallas_src>

<mosaic_0001>
module attributes {stable_mosaic.version = 11 : i64} {
  func.func @_ffn_kernel_f32out(%arg0: i32, %arg1: i32, %arg2: memref<8x128xf32, #tpu.memory_space<vmem>>, %arg3: memref<128x128xf32, #tpu.memory_space<vmem>>, %arg4: memref<1x256xf32, #tpu.memory_space<vmem>>, %arg5: memref<128x128xf32, #tpu.memory_space<vmem>>, %arg6: memref<1x128xf32, #tpu.memory_space<vmem>>, %arg7: memref<8x128xf32, #tpu.memory_space<vmem>>) attributes {dimension_semantics = [#tpu.dimension_semantics<parallel>, #tpu.dimension_semantics<arbitrary>], iteration_bounds = array<i64: 2, 2>, scalar_prefetch = 0 : i64, scratch_operands = 0 : i64, tpu.core_type = #tpu.core_type<tc>, window_params = [{transform_indices = @transform_0, window_bounds = array<i64: 8, 128>}, {transform_indices = @transform_1, window_bounds = array<i64: 128, 128>}, {pipeline_mode = #tpu.pipeline_mode<synchronous>, transform_indices = @transform_2, window_bounds = array<i64: 1, 256>}, {transform_indices = @transform_3, window_bounds = array<i64: 128, 128>}, {pipeline_mode = #tpu.pipeline_mode<synchronous>, transform_indices = @transform_4, window_bounds = array<i64: 1, 128>}, {transform_indices = @transform_5, window_bounds = array<i64: 8, 128>}]} {
    %c0_i32 = arith.constant 0 : i32
    %0 = arith.cmpi eq, %arg1, %c0_i32 : i32
    %1 = arith.extui %0 : i1 to i32
    %c0_i32_0 = arith.constant 0 : i32
    %2 = arith.cmpi ne, %1, %c0_i32_0 : i32
    scf.if %2 {
      %cst_14 = arith.constant 0.000000e+00 : f32
      %22 = vector.broadcast %cst_14 : f32 to vector<8x128xf32>
      %c0_15 = arith.constant 0 : index
      %c0_16 = arith.constant 0 : index
      %23 = vector.load %arg7[%c0_15, %c0_16] : memref<8x128xf32, #tpu.memory_space<vmem>>, vector<8x128xf32>
      tpu.vector_store %arg7[%c0_15, %c0_16], %22 {strides = array<i32>} : memref<8x128xf32, #tpu.memory_space<vmem>>, vector<8x128xf32>,
    } else {
    }
    %c128_i32 = arith.constant 128 : i32
    %3 = arith.muli %arg1, %c128_i32 : i32
    %4 = tpu.assume_multiple %3, 128 : i32
    %c0 = arith.constant 0 : index
    %5 = arith.index_cast %4 : i32 to index
    %6 = vector.load %arg4[%c0, %5] : memref<1x256xf32, #tpu.memory_space<vmem>>, vector<1x128xf32>
    %c0_1 = arith.constant 0 : index
    %c0_2 = arith.constant 0 : index
    %7 = vector.load %arg2[%c0_1, %c0_2] : memref<8x128xf32, #tpu.memory_space<vmem>>, vector<8x128xf32>
    %c0_3 = arith.constant 0 : index
    %c0_4 = arith.constant 0 : index
    %8 = vector.load %arg3[%c0_3, %c0_4] : memref<128x128xf32, #tpu.memory_space<vmem>>, vector<128x128xf32>
    %cst = arith.constant dense<0.000000e+00> : vector<8x128xf32>
    %9 = tpu.matmul %7, %8, %cst {dimension_numbers = #tpu.dot_dimension_numbers<[1], [0], [0], [1], [0, 0, 1, 1], [], []>} : vector<8x128xf32>, vector<128x128xf32>, vector<8x128xf32> -> vector<8x128xf32>
    %10 = vector.broadcast %6 : vector<1x128xf32> to vector<8x128xf32>
    %11 = arith.addf %9, %10 : vector<8x128xf32>
    %cst_5 = arith.constant 0.000000e+00 : f32
    %12 = vector.broadcast %cst_5 : f32 to vector<8x128xf32>
    %13 = arith.maximumf %11, %12 : vector<8x128xf32>
    %c0_6 = arith.constant 0 : index
    %c0_7 = arith.constant 0 : index
    %14 = vector.load %arg7[%c0_6, %c0_7] : memref<8x128xf32, #tpu.memory_space<vmem>>, vector<8x128xf32>
    %c0_8 = arith.constant 0 : index
    %c0_9 = arith.constant 0 : index
    %15 = vector.load %arg5[%c0_8, %c0_9] : memref<128x128xf32, #tpu.memory_space<vmem>>, vector<128x128xf32>
    %cst_10 = arith.constant dense<0.000000e+00> : vector<8x128xf32>
    %16 = tpu.matmul %13, %15, %cst_10 {dimension_numbers = #tpu.dot_dimension_numbers<[1], [0], [0], [1], [0, 0, 1, 1], [], []>} : vector<8x128xf32>, vector<128x128xf32>, vector<8x128xf32> -> vector<8x128xf32>
    %17 = arith.addf %14, %16 : vector<8x128xf32>
    %c0_11 = arith.constant 0 : index
    %c0_12 = arith.constant 0 : index
    %18 = vector.load %arg7[%c0_11, %c0_12] : memref<8x128xf32, #tpu.memory_space<vmem>>, vector<8x128xf32>
    tpu.vector_store %arg7[%c0_11, %c0_12], %17 {strides = array<i32>} : memref<8x128xf32, #tpu.memory_space<vmem>>, vector<8x128xf32>,
    %c1_i32 = arith.constant 1 : i32
    %19 = arith.cmpi eq, %arg1, %c1_i32 : i32
    %20 = arith.extui %19 : i1 to i32
    %c0_i32_13 = arith.constant 0 : i32
    %21 = arith.cmpi ne, %20, %c0_i32_13 : i32
    scf.if %21 {
      %c0_14 = arith.constant 0 : index
      %c0_15 = arith.constant 0 : index
      %22 = vector.load %arg7[%c0_14, %c0_15] : memref<8x128xf32, #tpu.memory_space<vmem>>, vector<8x128xf32>
      %c0_16 = arith.constant 0 : index
      %c0_17 = arith.constant 0 : index
      %23 = vector.load %arg6[%c0_16, %c0_17] : memref<1x128xf32, #tpu.memory_space<vmem>>, vector<1x128xf32>
      %24 = vector.broadcast %23 : vector<1x128xf32> to vector<8x128xf32>
      %25 = arith.addf %22, %24 : vector<8x128xf32>
      %c0_18 = arith.constant 0 : index
      %c0_19 = arith.constant 0 : index
      %26 = vector.load %arg7[%c0_18, %c0_19] : memref<8x128xf32, #tpu.memory_space<vmem>>, vector<8x128xf32>
      tpu.vector_store %arg7[%c0_18, %c0_19], %25 {strides = array<i32>} : memref<8x128xf32, #tpu.memory_space<vmem>>, vector<8x128xf32>,
    } else {
    }
    return
  }
  func.func @transform_0(%arg0: i32, %arg1: i32) -> (i32, i32) {
    %c0_i32 = arith.constant 0 : i32
    %c0_i32_0 = arith.constant 0 : i32
    return %arg0, %c0_i32 : i32, i32
  }
  func.func @transform_1(%arg0: i32, %arg1: i32) -> (i32, i32) {
    %c0_i32 = arith.constant 0 : i32
    %c0_i32_0 = arith.constant 0 : i32
    return %c0_i32, %arg1 : i32, i32
  }
  func.func @transform_2(%arg0: i32, %arg1: i32) -> (i32, i32) {
    %c0_i32 = arith.constant 0 : i32
    %c0_i32_0 = arith.constant 0 : i32
    %c0_i32_1 = arith.constant 0 : i32
    return %c0_i32, %c0_i32_0 : i32, i32
  }
  func.func @transform_3(%arg0: i32, %arg1: i32) -> (i32, i32) {
    %c0_i32 = arith.constant 0 : i32
    %c0_i32_0 = arith.constant 0 : i32
    return %arg1, %c0_i32 : i32, i32
  }
  func.func @transform_4(%arg0: i32, %arg1: i32) -> (i32, i32) {
    %c0_i32 = arith.constant 0 : i32
    %c0_i32_0 = arith.constant 0 : i32
    %c0_i32_1 = arith.constant 0 : i32
    return %c0_i32, %c0_i32_0 : i32, i32
  }
  func.func @transform_5(%arg0: i32, %arg1: i32) -> (i32, i32) {
    %c0_i32 = arith.constant 0 : i32
    %c0_i32_0 = arith.constant 0 : i32
    return %arg0, %c0_i32 : i32, i32
  }
}

</mosaic_0001>

<bundles_post_ra>
// kernel: feedforward.1
= control target key start
LH: loop header
LB: loop body
LE: loop exit
PB: predicated region body
PF: predicated region fallthrough
CT: control target
= control target key end

     0   :  { %s1280_s0 = inlined_call_operand.hbm [shape: f32[16,128], index: 0, kind: input, shape index: {}]   ;;  %s1281_s1 = inlined_call_operand.hbm [shape: f32[128,256], index: 1, kind: input, shape index: {}]   ;;  %s1282_s2 = inlined_call_operand.vmem [shape: f32[1,256], index: 2, kind: input, shape index: {}]   ;;  %s1283_s3 = inlined_call_operand.hbm [shape: f32[256,128], index: 3, kind: input, shape index: {}]   ;;  %s1284_s4 = inlined_call_operand.vmem [shape: f32[1,128], index: 4, kind: input, shape index: {}]   ;;  %s1285_s5 = inlined_call_operand.hbm [shape: f32[16,128], index: 5, kind: output, shape index: {}]  }
   0x1   :  { %1299 = sst [smem:[#allocation23_spill]] %s1281_s1 }
   0x2   :  { %1300 = sst [smem:[#allocation24_spill]] %s1284_s4 }
   0x3   :  { %1301 = sst [smem:[#allocation25_spill]] %s1285_s5 }
   0x4   :  { %10 = vsyncpa [#allocation3], 0 }
   0x5   :  { %12 = vsyncpa [#allocation3 + $0x1], 0 }
   0x6   :  { %13 = vsyncpa [#allocation6], 0 }
   0x7   :  { %15 = vsyncpa [#allocation6 + $0x1], 0 }
   0x8   :  { %16 = vsyncpa [#allocation4], 0 }
   0x9   :  { %18 = vsyncpa [#allocation4 + $0x1], 0  ;;  %s971_s18 = smov 0   ;;  %s973_s19 = smov 0  }
   0xa   :  { %s975_s20 = smov 0   ;;  %s977_s21 = smov 0  }
   0xb   :  { %s979_s22 = smov 0   ;;  %s981_s23 = smov 0  }
   0xc   :  { %s983_s24 = smov 0   ;;  %s985_s25 = smov 0  }
   0xd   :  { %s987_s26 = smov 0   ;;  %s989_s27 = smov 0  }
   0xe   :  { %s991_s28 = smov 0  }
   0xf LB: > { %1302 = sst [smem:[#allocation12_spill]] %s903_s20  ;;  %p51_p0 = scmp.eq.s32.totalorder %s935_s28, 0  ;;  %s935_s28 = sphi %s991_s28, %s24_s28   ;;  %s931_s27 = sphi %s989_s27, %s1337_s27   ;;  %s927_s26 = sphi %s987_s26, %s1343_s26   ;;  %s923_s25 = sphi %s985_s25, %s1335_s25   ;;  %s919_s24 = sphi %s983_s24, %s1342_s24   ;;  %s915_s23 = sphi %s981_s23, %s1334_s23   ;;  %s911_s22 = sphi %s979_s22, %s1341_s22   ;;  %s907_s21 = sphi %s977_s21, %s1340_s21   ;;  %s903_s20 = sphi %s975_s20, %s1332_s20   ;;  %s899_s19 = sphi %s973_s19, %s1339_s19   ;;  %s895_s18 = sphi %s971_s18, %s1338_s18  }
  0x10   : > { %1303 = sst [smem:[#allocation13_spill]] %s907_s21  ;;  %p76_p1 = scmp.ne.s32.totalorder %s903_s20, %s899_s19 }
  0x11   : > { %1304 = sst [smem:[#allocation14_spill]] %s915_s23  ;;  %p1290_p2 = scmp.lt.s32.totalorder %s935_s28, 4 }
  0x12   : > { %1305 = sst [smem:[#allocation15_spill]] %s923_s25  ;;  %s225_s30 = sand.u32 1, %s935_s28  }
  0x13   : > { %1306 = sst [smem:[#allocation16_spill]] %s931_s27  ;;  %p78_p3 = por %p76_p1, %p51_p0 }
  0x14   : > { %s227_s6 = sand.u32 1, %s903_s20   ;;  %s584_s7 = sshll.u32 %s927_s26, 3 }
  0x15   : > { %s1036_s8 = sshll.u32 %s227_s6, 7  ;;  %s1307_s1 = sld [smem:[#allocation23_spill]] }
  0x16   : > { %s229_s13 = scalar_lea.vmem [#allocation5], %s1036_s8  ;;  %p1044_p4 = pnand %p1290_p2, %p78_p3 }
  0x17   : > { %s236_s14 = sshll.u32 %s229_s13, 4  ;;  %s1048_s16 = scalar_lea.sflag [#allocation6], %s225_s30  ;;  %s237_s14 = int_to_ptr.vmem [resolvable:$true] %s236_s14 }
  0x18   : > { %s937_s17 = smov 256   ;;  %s1286_s6 = smov 128  }
  0x19   : > { %p588_p5 = scmp.ge.s32.totalorder %s935_s28, 1  ;;  %p266_p6 = scmp.lt.s32.totalorder %s935_s28, 5 }
  0x1a   : > { %s1062_s9 = sadd.s32 4294967295, %s935_s28   ;;  %s578_s10 = sadd.s32 4294967294, %s935_s28  }
  0x1b   : > { %s233_s11 = scalar_lea.hbm %s1307_s1, %s584_s7  ;;  %s1287_s7 = smov 8  }
  0x1c   : > { %s234_s12 = sshll.u32 %s233_s11, 4  ;;  %p1057_p7 = pnand %p588_p5, %p266_p6  ;;  %s235_s12 = int_to_ptr.hbm [resolvable:$true] %s234_s12 }
  0x1d   : > { %615 = dma.hbm_to_vmem [thread:$0]  (!%p1044_p4), %s235_s12, 2048, %s237_s14, %s1048_s16, %s937_s17, %s1286_s6, %s1287_s7  }
  0x1e   : > { %s33_s11 = sadd.s32 1, %s927_s26  ;;  %s36_s13 = sadd.s32 1, %s931_s27 }
  0x1f   : > { %p34_p8 = scmp.ge.s32.totalorder %s33_s11, 2  ;;  %s43_s12 = sadd.s32 1, %s915_s23 }
  0x20   : > { %p50_p9 = scmp.ne.s32.totalorder %s915_s23, %s911_s22  ;;  %p56_p11 = scmp.ne.s32.totalorder %s911_s22, %s907_s21 }
  0x21   : > { %s1345_s11 = smov (%p34_p8, %s33_s11), 0  ;;  %s1347_s13 = smov (!%p34_p8, %s36_s13), %s931_s27 }
  0x22   : > { %1310 = sst [smem:[#allocation17_spill]] %s1345_s11  ;;  %p1078_p10 = por %p51_p0, %p50_p9 }
  0x23   : > { %p38_p12 = scmp.ge.s32.totalorder %s1347_s13, 2  ;;  %p57_p13 = scmp.eq.s32.totalorder %s1062_s9, 0 }
  0x24   : > { %s66_s17 = ssub.s32 %s927_s26, %s1345_s11  ;;  %p82_p1 = scmp.ne.s32.totalorder %s899_s19, %s895_s18 }
  0x25   : > { %s1349_s13 = smov (%p38_p12, %s1347_s13), 0  ;;  %p1094_p3 = por %p57_p13, %p56_p11 }
  0x26   : > { %1312 = sst [smem:[#allocation18_spill]] %s1349_s13  ;;  %p67_p0 = scmp.eq.s32.totalorder %s66_s17, 0 }
  0x27   : > { %s40_s7 = ssub.s32 %s931_s27, %s1349_s13  ;;  %p1100_p5 = por %p82_p1, %p57_p13 }
  0x28   : > { %p41_p6 = scmp.eq.s32.totalorder %s40_s7, 0  ;;  %p174_p8 = scmp.eq.s32.totalorder %s1062_s9, 3 }
  0x29   : > { %s1315_s1 = sadd.s32 1, %s903_s20  ;;  %p180_p2 = scmp.eq.s32.totalorder %s578_s10, 3 }
  0x2a   : > { %s1108_s18 = scalar_select %p67_p0, %s903_s20, %s1315_s1  }
  0x2b   : > { %s1111_s11 = scalar_select %p41_p6, %s915_s23, %s43_s12  }
  0x2c   : > { %1316 = sst [smem:[#allocation19_spill]] %s1108_s18  ;;  %p1116_p12 = por %p174_p8, %p50_p9 }
  0x2d   : > { %1317 = sst [smem:[#allocation20_spill]] %s1111_s11  ;;  %s206_s17 = sand.u32 1, %s915_s23  }
  0x2e   : > { %s1318_s5 = scalar_select %p1116_p12, 1, 0 }
  0x2f   : > { %s582_s13 = sshll.u32 %s931_s27, 3  ;;  %p1125_p13 = por %p180_p2, %p56_p11 }
  0x30   : > { %1319 = sst [smem:[#allocation21_spill]] %s1318_s5  ;;  %s581_s25 = sshll.u32 %s206_s17, 3 }
  0x31   : > { %s1320_s7 = scalar_select %p1125_p13, 1, 0 }
  0x32   : > { %s214_s12 = scalar_lea.hbm %s1280_s0, %s582_s13  ;;  %s210_s18 = scalar_lea.vmem [#allocation2], %s581_s25 }
  0x33   : > { %1321 = sst [smem:[#allocation22_spill]] %s1320_s7  ;;  %s216_s11 = sshll.u32 %s214_s12, 4  ;;  %s217_s11 = int_to_ptr.hbm [resolvable:$true] %s216_s11 }
  0x34   : > { %s218_s20 = sshll.u32 %s210_s18, 4  ;;  %p1322_p9 = scmp.lt.s32.totalorder %s935_s28, 4  ;;  %s219_s20 = int_to_ptr.vmem [resolvable:$true] %s218_s20 }
  0x35   : > { %s600_s10 = sshll.u32 %s927_s26, 7  ;;  %s207_s21 = scalar_lea.sflag [#allocation3], %s206_s17 }
  0x36   : > { %p610_p1 = pnand %p1322_p9, %p1078_p10  ;;  %s255_s7 = scalar_lea.hbm %s1283_s3, %s600_s10 }
  0x37   : > { %s256_s5 = sshll.u32 %s255_s7, 4  ;;  %s250_s4 = scalar_lea.vmem [#allocation7], %s1036_s8  ;;  %s257_s5 = int_to_ptr.hbm [resolvable:$true] %s256_s5 }
  0x38   : > { %612 = dma.hbm_to_vmem [thread:$0]  (!%p610_p1), %s217_s11, 128, %s219_s20, %s207_s21  }
  0x39   : > { %s258_s13 = sshll.u32 %s250_s4, 4  ;;  %s1323_s1 = smov 8   ;;  %s259_s13 = int_to_ptr.vmem [resolvable:$true] %s258_s13 }
  0x3a   : > { %s1324_s25 = smov 128   ;;  %270 = sbr.rel (%p1057_p7) target bundleno = 400 (0x190), region = 40 }
  0x3b   : > { %618 = dma.hbm_to_vmem [thread:$0]  (!%p1044_p4), %s257_s5, 2048, %s259_s13, %s1048_s16, %s1324_s25, %s1324_s25, %s1323_s1  }
  0x3c   : > { %s1150_s14 = sand.u32 (!%p1057_p7), 1, %s911_s22  }
  0x3d   : > { %s589_s20 = sshll.u32 (!%p1057_p7), %s1150_s14, 3  ;;  %s273_s21 = scalar_lea.sflag (!%p1057_p7), [#allocation3], %s1150_s14 }
  0x3e   : > { %s1154_s23 = scalar_lea.vmem (!%p1057_p7), [#allocation2], %s589_s20 }
  0x3f   : > { %882 = dma.done.wait (%p1094_p3), %s273_s21, 128  }
  0x40   : > { %884 = vsyncadd (%p1094_p3), %s273_s21, 4294967168  ;;  %s282_s5 = sand.u32 1, %s1062_s9   ;;  %s284_s27 = sand.u32 1, %s899_s19  }
  0x41   : > { %s590_s8 = sshll.u32 %s284_s27, 7  ;;  %s283_s15 = scalar_lea.sflag [#allocation6], %s282_s5 }
  0x42   : > { %s1162_s16 = scalar_lea.vmem [#allocation5], %s590_s8 }
  0x43   : > { %886 = dma.done.wait (%p1100_p5), %s283_s15, 4096  }
  0x44   : > { %888 = vsyncadd (%p1100_p5), %s283_s15, 4294963200  ;;  %s1168_s30 = scalar_lea.vmem [#allocation7], %s590_s8  ;;  %s1170_s11 = scalar_lea.vmem [#allocation8], %s589_s20 }
  0x45   : > { %p593_p2 = scmp.ne.s32.totalorder %s919_s24, 0 }
  0x47   : > { %338 = sbr.rel (%p593_p2) target bundleno = 78 (0x4e), region = 56 }
  0x4c   : > { %v940_v0 = vmov 0.0  }
  0x4d   : > { %339 = vst [vmem:[%s1170_s11] sm:$0xff] %v940_v0 }
  0x4e PF: > { %v361_v1 = vld [vmem:[%s1162_s16 + $0x78] sm:$0xff]  ;;  %v360_v2 = vld [vmem:[%s1162_s16 + $0x70] sm:$0xff]  ;;  %v359_v3 = vld [vmem:[%s1162_s16 + $0x68] sm:$0xff]  ;;  %s594_s29 = sshll.u32 %s919_s24, 7  ;;  %p595_p4 = scmp.ne.s32.totalorder %s919_s24, 1 }
  0x4f   : > { %365 = vmatpush.msra.mxu0 %v361_v1  ;;  %v358_v4 = vld [vmem:[%s1162_s16 + $0x60] sm:$0xff]  ;;  %v402_v5 = vld [vmem:[%s1168_s30 + $0x78] sm:$0xff]  ;;  %v401_v7 = vld [vmem:[%s1168_s30 + $0x70] sm:$0xff]  ;;  %s1182_s6 = sshra.s32 %s594_s29, 7  ;;  %s1325_s13 = sld [smem:[#allocation24_spill]] (!%p595_p4) }
  0x50   : > { %v357_v6 = vld [vmem:[%s1162_s16 + $0x58] sm:$0xff]  ;;  %403 = vmatpush.msra.mxu1 %v402_v5  ;;  %v400_v8 = vld [vmem:[%s1168_s30 + $0x68] sm:$0xff]  ;;  %v356_v9 = vld [vmem:[%s1162_s16 + $0x50] sm:$0xff]  ;;  %s343_s17 = scalar_lea.vmem %s1282_s2, %s1182_s6 }
  0x51   : > { %366 = vmatpush.msra.mxu0 %v360_v2  ;;  %v399_v10 = vld [vmem:[%s1168_s30 + $0x60] sm:$0xff]  ;;  %v355_v11 = vld [vmem:[%s1162_s16 + $0x48] sm:$0xff]  ;;  %v398_v12 = vld [vmem:[%s1168_s30 + $0x58] sm:$0xff] }
  0x52   : > { %404 = vmatpush.msra.mxu1 %v401_v7  ;;  %v354_v13 = vld [vmem:[%s1162_s16 + $0x40] sm:$0xff]  ;;  %v397_v14 = vld [vmem:[%s1168_s30 + $0x50] sm:$0xff]  ;;  %v353_v15 = vld [vmem:[%s1162_s16 + $0x38] sm:$0xff] }
  0x53   : > { %367 = vmatpush.msra.mxu0 %v359_v3  ;;  %v396_v16 = vld [vmem:[%s1168_s30 + $0x48] sm:$0xff]  ;;  %v352_v17 = vld [vmem:[%s1162_s16 + $0x30] sm:$0xff]  ;;  %v395_v18 = vld [vmem:[%s1168_s30 + $0x40] sm:$0xff] }
  0x54   : > { %405 = vmatpush.msra.mxu1 %v400_v8  ;;  %v351_v19 = vld [vmem:[%s1162_s16 + $0x28] sm:$0xff]  ;;  %v394_v20 = vld [vmem:[%s1168_s30 + $0x38] sm:$0xff]  ;;  %v350_v21 = vld [vmem:[%s1162_s16 + $0x20] sm:$0xff] }
  0x55   : > { %368 = vmatpush.msra.mxu0 %v358_v4  ;;  %v393_v22 = vld [vmem:[%s1168_s30 + $0x30] sm:$0xff]  ;;  %v349_v23 = vld [vmem:[%s1162_s16 + $0x18] sm:$0xff]  ;;  %v392_v24 = vld [vmem:[%s1168_s30 + $0x28] sm:$0xff] }
  0x56   : > { %406 = vmatpush.msra.mxu1 %v399_v10  ;;  %v348_v25 = vld [vmem:[%s1162_s16 + $0x10] sm:$0xff]  ;;  %v391_v26 = vld [vmem:[%s1168_s30 + $0x20] sm:$0xff]  ;;  %v347_v27 = vld [vmem:[%s1162_s16 + $0x8] sm:$0xff] }
  0x57   : > { %369 = vmatpush.msra.mxu0 %v357_v6  ;;  %v390_v28 = vld [vmem:[%s1168_s30 + $0x18] sm:$0xff]  ;;  %v346_v29 = vld [vmem:[%s1162_s16] sm:$0xff]  ;;  %v389_v31 = vld [vmem:[%s1168_s30 + $0x10] sm:$0xff] }
  0x58   : > { %407 = vmatpush.msra.mxu1 %v398_v12  ;;  %v345_v30 = vld [vmem:[%s1154_s23] sm:$0xff]  ;;  %v388_v32 = vld [vmem:[%s1168_s30 + $0x8] sm:$0xff]  ;;  %v387_v33 = vld [vmem:[%s1168_s30] sm:$0xff] }
  0x59   : > { %370 = vmatpush.msra.mxu0 %v356_v9  ;;  %v717_v34 = vld [vmem:[%s343_s17] ss:$0 sm:$0xff]  ;;  %v386_v38 = vld [vmem:[%s1170_s11] sm:$0xff] }
  0x5a   : > { %408 = vmatpush.msra.mxu1 %v397_v14 }
  0x5b   : > { %371 = vmatpush.msra.mxu0 %v355_v11 }
  0x5c   : > { %409 = vmatpush.msra.mxu1 %v396_v16 }
  0x5d   : > { %372 = vmatpush.msra.mxu0 %v354_v13 }
  0x5e   : > { %410 = vmatpush.msra.mxu1 %v395_v18 }
  0x5f   : > { %373 = vmatpush.msra.mxu0 %v353_v15 }
  0x60   : > { %411 = vmatpush.msra.mxu1 %v394_v20 }
  0x61   : > { %374 = vmatpush.msra.mxu0 %v352_v17 }
  0x62   : > { %412 = vmatpush.msra.mxu1 %v393_v22 }
  0x63   : > { %375 = vmatpush.msra.mxu0 %v351_v19 }
  0x64   : > { %413 = vmatpush.msra.mxu1 %v392_v24 }
  0x65   : > { %376 = vmatpush.msra.mxu0 %v350_v21 }
  0x66   : > { %414 = vmatpush.msra.mxu1 %v391_v26 }
  0x67   : > { %377 = vmatpush.msra.mxu0 %v349_v23 }
  0x68   : > { %415 = vmatpush.msra.mxu1 %v390_v28 }
  0x69   : > { %378 = vmatpush.msra.mxu0 %v348_v25 }
  0x6a   : > { %416 = vmatpush.msra.mxu1 %v389_v31 }
  0x6b   : > { %379 = vmatpush.msra.mxu0 %v347_v27 }
  0x6c   : > { %417 = vmatpush.msra.mxu1 %v388_v32 }
  0x6d   : > { %380 = vmatpush.msra.mxu0 %v346_v29 }
  0x6e   : > { %381 = vmatmul.f32.vlgmr.msra.gmra.mxu0 %v345_v30  ;;  %418 = vmatpush.msra.mxu1 %v387_v33 }
  0xeb   : > { %v382_v35 = vpop.f32.mrf.mxu0 }
  0xec   : > { %v383_v36 = vadd.f32 %v717_v34, %v382_v35 }
  0xee   : > { %v385_v37 = vmax.f32 %v383_v36, 0.0 }
  0xf0   : > { %419 = vmatmul.f32.vlgmr.msra.gmra.mxu1 %v385_v37 }
 0x16c   : > { %428 = sbr.rel (%p595_p4) target bundleno = 379 (0x17b), region = 60 }
 0x16d   : > { %v420_v39 = vpop.f32.mrf.mxu1 }
 0x16e   : > { %v423_v40 = vadd.f32 %v420_v39, %v386_v38 }
 0x170   : > { %424 = vst [vmem:[%s1170_s11] sm:$0xff] %v423_v40 }
 0x171   : > { %v718_v42 = vld [vmem:[%s1325_s13] ss:$0 sm:$0xff] }
 0x177   : > { %v429_v41 = vld [vmem:[%s1170_s11] sm:$0xff] }
 0x178   : > { %v434_v43 = vadd.f32 %v718_v42, %v429_v41 }
 0x17a   : > { %435 = vst [vmem:[%s1170_s11] sm:$0xff] %v434_v43 }
 0x17b PF: > { %s1326_s1 = sld [smem:[#allocation15_spill]]  ;;  %s449_s27 = sshll.u32 %s1170_s11, 4  ;;  %s450_s27 = int_to_ptr.vmem [resolvable:$true] %s449_s27 }
 0x17c   : > { %s1328_s5 = sld [smem:[#allocation25_spill]]  ;;  %s437_s15 = scalar_lea.sflag [#allocation4], %s1150_s14 }
 0x181   : > { %s597_s20 = sshll.u32 %s1326_s1, 3 }
 0x182   : > { %s447_s24 = scalar_lea.hbm %s1328_s5, %s597_s20  ;;  %s829_s9 = scalar_lea.hbm %s1328_s5, 16 }
 0x183   : > { %s451_s8 = sshll.u32 %s447_s24, 4  ;;  %s452_s8 = int_to_ptr.hbm [resolvable:$true] %s451_s8 }
 0x184   : > { %s823_s16 = sshra.s32 %s452_s8, 4  ;;  %s824_s16 = int_to_ptr.hbm [resolvable:$true] %s823_s16 }
 0x185   : > { %s825_s30 = scalar_lea.hbm %s824_s16, 8  ;;  %p830_p3 = scmp.lt.s32.totalorder %s824_s16, %s1328_s5 }
 0x186   : > { %p826_p7 = scmp.ne.s32.totalorder %s824_s16, %s825_s30  ;;  %p831_p0 = scmp.lt.s32.totalorder %s829_s9, %s825_s30 }
 0x188   : > { %p827_p10 = pnand %p826_p7, %p1116_p12  ;;  %p832_p5 = por %p831_p0, %p830_p3 }
 0x18a   : > { %p828_p11 = pneg %p827_p10 }
 0x18c   : > { %p833_p6 = pnand %p832_p5, %p828_p11 }
 0x18e   : > { %836 = shalt.err (!%p833_p6)
}
 0x18f   : > { %607 = dma.vmem_to_hbm [thread:$0]  (%p1116_p12), %s450_s27, 128, %s452_s8, %s437_s15  }
 0x190 PF: > { %s1329_s14 = sld [smem:[#allocation13_spill]]  ;;  %p624_p8 = scmp.ge.s32.totalorder %s935_s28, 2 }
 0x192   : > { %p620_p9 = pnand %p624_p8, %p1125_p13 }
 0x194   : > { %p621_p1 = pneg %p620_p9 }
 0x196   : > { %s463_s7 = sand.u32 1, %s1329_s14  }
 0x197   : > { %s464_s12 = scalar_lea.sflag [#allocation4], %s463_s7 }
 0x198   : > { %890 = dma.done.wait (%p621_p1), %s464_s12, 128  }
 0x199   : > { %892 = vsyncadd (%p621_p1), %s464_s12, 4294967168  ;;  %s24_s28 = sadd.s32 1, %s935_s28   ;;  %s1331_s10 = sld [smem:[#allocation12_spill]] }
 0x19a   : > { %p21_p2 = scmp.ge.s32.totalorder %s24_s28, 6   ;;  %s1332_s20 = sld [smem:[#allocation19_spill]] }
 0x19b   : > { %s1333_s4 = sld [smem:[#allocation14_spill]]  ;;  %s1338_s18 = smov %s899_s19 }
 0x19c   : > { %s1334_s23 = sld [smem:[#allocation20_spill]]  ;;  %s1340_s21 = smov %s911_s22 }
 0x19d   : > { %s1335_s25 = sld [smem:[#allocation16_spill]]  ;;  %s1342_s24 = smov %s927_s26 }
 0x19e   : > { %s1336_s13 = sld [smem:[#allocation17_spill]] }
 0x19f   : > { %s1337_s27 = sld [smem:[#allocation18_spill]]  ;;  %s1339_s19 = smov %s1331_s10 }
 0x1a0   :  { %23 = sbr.rel (!%p21_p2) target bundleno = 15 (0xf), region = 118 }
 0x1a1   : > { %s1341_s22 = smov %s1333_s4 }
 0x1a4   : > { %s1343_s26 = smov %s1336_s13 }
 0x1a5   :  { %470 = vsyncpa [#allocation3], 1 }
 0x1a6   :  { %472 = vsyncpa [#allocation3 + $0x1], 1 }
 0x1a7   :  { %473 = vsyncpa [#allocation6], 1 }
 0x1a8   :  { %475 = vsyncpa [#allocation6 + $0x1], 1 }
 0x1a9   :  { %476 = vsyncpa [#allocation4], 1 }
 0x1aa   :  { %478 = vsyncpa [#allocation4 + $0x1], 1 }

</bundles_post_ra>
